<compile_context>
chip_gen: v7x
topology: tpu7x:2x2x1
jax: 0.10.0
libtpu: 0.0.40
codegen_flags: <defaults>
</compile_context>

<pallas_src>
import math

import numpy as np
import jax
import jax.numpy as jnp
from jax.experimental import pallas as pl
from jax.experimental.pallas import tpu as pltpu


def _linear_resize_matrix(out_size: int, in_size: int) -> np.ndarray:
    """Interpolation matrix W (out_size, in_size) matching
    torch.nn.functional.interpolate(mode='linear', align_corners=True)."""
    if out_size == 1:
        src = np.zeros((1,), dtype=np.float64)
    else:
        src = np.arange(out_size, dtype=np.float64) * ((in_size - 1) / (out_size - 1))
    lo = np.clip(np.floor(src).astype(np.int64), 0, in_size - 1)
    hi = np.clip(lo + 1, 0, in_size - 1)
    frac = (src - lo).astype(np.float32)
    w = np.zeros((out_size, in_size), dtype=np.float32)
    rows = np.arange(out_size)
    np.add.at(w, (rows, lo), 1.0 - frac)
    np.add.at(w, (rows, hi), frac)
    return w


def _resize_kernel(x_ref, wht_ref, wwt_ref, o_ref):
    # x_ref:   (TB, H_in, W_in)
    # wht_ref: (H_in, H_out)   -- Wh^T, f32
    # wwt_ref: (W_in, W_out)   -- (factor * Ww)^T, f32 (factor folded in)
    # o_ref:   (TB, H_out, W_out)
    x = x_ref[...].astype(jnp.float32)

    # Height pass: move H_in onto the lane axis (minor-dim XLU transpose), then
    # one stacked slab contraction: M = TB*W_in, K = H_in, N = H_out.
    xt = jnp.swapaxes(x, 1, 2)                           # (TB, W_in, H_in)
    y = jax.lax.dot_general(
        xt, wht_ref[...],
        dimension_numbers=(((2,), (0,)), ((), ())),
        preferred_element_type=jnp.float32)              # (TB, W_in, H_out)

    # Width pass: W_in back onto lanes, M = TB*H_out, K = W_in, N = W_out.
    yt = jnp.swapaxes(y, 1, 2)                           # (TB, H_out, W_in)
    out = jax.lax.dot_general(
        yt, wwt_ref[...],
        dimension_numbers=(((2,), (0,)), ((), ())),
        preferred_element_type=jnp.float32)              # (TB, H_out, W_out)

    o_ref[...] = out.astype(o_ref.dtype)


def _vmem_policy():
    """Generation-aware VMEM limit / per-block budget / grid-split policy."""
    vmem_cap = 128 * 1024 * 1024
    try:
        vmem_cap = int(getattr(pltpu.get_tpu_info(), "vmem_capacity_bytes", vmem_cap))
    except Exception:
        pass
    if vmem_cap <= 64 * 1024 * 1024:
        # v7x-class: 64 MiB VMEM per TensorCore, 2 TCs per chip -> modest
        # blocks, keep >=2 grid steps so both cores get work.
        return {"vmem_limit": 36 * 1024 * 1024,
                "block_budget": 10 * 1024 * 1024,
                "split_two": True}
    # v5e/v6e-class: 128 MiB VMEM, single TensorCore -> fewer, larger blocks.
    return {"vmem_limit": 64 * 1024 * 1024,
            "block_budget": 28 * 1024 * 1024,
            "split_two": False}


def _choose_block(nc, h_in, w_in, h_out, w_out, itemsize, block_budget, split_two):
    """Pick (tb, grid_steps) with cdiv-based tiling (padded tail, no divisor hunt)."""
    # Double-buffered in/out blocks (input dtype) + f32 temporaries of both
    # passes (conservative: xt, y, yt, out all counted).
    per_img = (2 * (h_in * w_in + h_out * w_out) * itemsize
               + 4 * (h_in * w_in + w_in * h_out + h_out * w_in + h_out * w_out))
    # Weight matrices are double-buffered by the default pipeline; account for
    # them as fixed overhead so the chosen TB still fits.
    fixed = 2 * 4 * (h_in * h_out + w_in * w_out)
    avail = max(per_img, block_budget - fixed)
    max_tb = max(1, avail // per_img)

    steps = int(pl.cdiv(nc, max_tb))
    if split_two and nc >= 2:
        steps = max(steps, 2)            # only on 2-TensorCore (v7x) parts
    tb = int(pl.cdiv(nc, steps))
    return tb, steps


def resize_transform_2d(x: jnp.ndarray, vel_resize: float) -> jnp.ndarray:
    """Pallas implementation of ResizeTransform.forward for ndims=2, NCHW input."""
    factor = 1.0 / float(vel_resize)
    if factor == 1.0:
        return x

    n, c, h_in, w_in = x.shape
    # PyTorch interpolate(scale_factor=f): out_size = floor(in_size * f)
    h_out = int(math.floor(float(h_in) * factor))
    w_out = int(math.floor(float(w_in) * factor))

    # f32 weights; the scalar factor is folded into the (f32) width weights so
    # scaling stays in f32 regardless of the input dtype.
    wht = jnp.asarray(_linear_resize_matrix(h_out, h_in).T, dtype=jnp.float32)
    wwt = jnp.asarray((factor * _linear_resize_matrix(w_out, w_in)).T, dtype=jnp.float32)

    nc = n * c
    x_flat = x.reshape(nc, h_in, w_in)

    itemsize = jnp.dtype(x.dtype).itemsize
    policy = _vmem_policy()
    tb, steps = _choose_block(nc, h_in, w_in, h_out, w_out, itemsize,
                              policy["block_budget"], policy["split_two"])
    nc_pad = tb * steps
    if nc_pad != nc:
        # cdiv-based tail: pad with zero images, slice the result afterwards.
        x_flat = jnp.pad(x_flat, ((0, nc_pad - nc), (0, 0), (0, 0)))

    flops = 2 * nc_pad * (w_in * h_in * h_out + h_out * w_in * w_out)
    bytes_accessed = int((nc_pad * h_in * w_in + nc_pad * h_out * w_out) * itemsize
                         + (wht.size + wwt.size) * 4)

    out_flat = pl.pallas_call(
        _resize_kernel,
        out_shape=jax.ShapeDtypeStruct((nc_pad, h_out, w_out), x.dtype),
        grid_spec=pltpu.PrefetchScalarGridSpec(
            num_scalar_prefetch=0,
            grid=(steps,),
            in_specs=[
                pl.BlockSpec((tb, h_in, w_in), lambda i: (i, 0, 0)),
                pl.BlockSpec((h_in, h_out), lambda i: (0, 0)),
                pl.BlockSpec((w_in, w_out), lambda i: (0, 0)),
            ],
            out_specs=pl.BlockSpec((tb, h_out, w_out), lambda i: (i, 0, 0)),
        ),
        compiler_params=pltpu.CompilerParams(
            dimension_semantics=("parallel",),
            vmem_limit_bytes=policy["vmem_limit"],
        ),
        cost_estimate=pl.CostEstimate(
            flops=int(flops), transcendentals=0, bytes_accessed=bytes_accessed),
    )(x_flat, wht, wwt)

    if nc_pad != nc:
        out_flat = out_flat[:nc]
    return out_flat.reshape(n, c, h_out, w_out)


# TODO(synk): ndims=3 (trilinear) and ndims=1 (linear) paths are not implemented;
# only the bilinear (ndims=2) case is covered by this kernel.


def _ref_resize(x, vel_resize):
    """Pure-JAX reference for align_corners=True bilinear ResizeTransform."""
    factor = 1.0 / float(vel_resize)
    if factor == 1.0:
        return x
    n, c, h_in, w_in = x.shape
    h_out = int(math.floor(h_in * factor))
    w_out = int(math.floor(w_in * factor))

    def grid_1d(o, i):
        if o == 1:
            return jnp.zeros((1,), jnp.float32)
        return jnp.arange(o, dtype=jnp.float32) * ((i - 1) / (o - 1))

    ys = grid_1d(h_out, h_in)
    xs = grid_1d(w_out, w_in)
    y0 = jnp.clip(jnp.floor(ys).astype(jnp.int32), 0, h_in - 1)
    y1 = jnp.clip(y0 + 1, 0, h_in - 1)
    x0 = jnp.clip(jnp.floor(xs).astype(jnp.int32), 0, w_in - 1)
    x1 = jnp.clip(x0 + 1, 0, w_in - 1)
    wy = (ys - y0.astype(jnp.float32))[:, None]
    wx = (xs - x0.astype(jnp.float32))[None, :]
    xf = x.astype(jnp.float32)

    def g(yi, xi):
        return xf[:, :, yi[:, None], xi[None, :]]

    out = ((1 - wy) * (1 - wx) * g(y0, x0) + (1 - wy) * wx * g(y0, x1)
           + wy * (1 - wx) * g(y1, x0) + wy * wx * g(y1, x1))
    return (factor * out).astype(x.dtype)


if __name__ == "__main__":
    key = jax.random.PRNGKey(0)
    # Velocity field: batch=2, channels=ndims=2, spatial 16x16 (NCHW).
    x = jax.random.normal(key, (2, 2, 16, 16), dtype=jnp.float32)

    # factor > 1 branch (vel_resize=0.5 -> factor=2.0, upsample to 32x32)
    y_up = resize_transform_2d(x, vel_resize=0.5)
    # factor < 1 branch (vel_resize=2.0 -> factor=0.5, downsample to 8x8)
    y_dn = resize_transform_2d(x, vel_resize=2.0)

    jax.block_until_ready(y_up)
    jax.block_until_ready(y_dn)

    assert y_up.shape == (2, 2, 32, 32), y_up.shape
    assert y_dn.shape == (2, 2, 8, 8), y_dn.shape

    ref_up = _ref_resize(x, 0.5)
    ref_dn = _ref_resize(x, 2.0)
    assert jnp.allclose(y_up, ref_up, atol=1e-4, rtol=1e-4)
    assert jnp.allclose(y_dn, ref_dn, atol=1e-4, rtol=1e-4)

    print("KERNEL_OK")
</pallas_src>

<mosaic_0001>
module attributes {stable_mosaic.version = 11 : i64} {
  func.func @_resize_kernel(%arg0: i32, %arg1: memref<4x16x16xf32, #tpu.memory_space<vmem>>, %arg2: memref<16x32xf32, #tpu.memory_space<vmem>>, %arg3: memref<16x32xf32, #tpu.memory_space<vmem>>, %arg4: memref<4x32x32xf32, #tpu.memory_space<vmem>>) attributes {dimension_semantics = [#tpu.dimension_semantics<parallel>], iteration_bounds = array<i64: 1>, scalar_prefetch = 0 : i64, scratch_operands = 0 : i64, tpu.core_type = #tpu.core_type<tc>, window_params = [{transform_indices = @transform_0, window_bounds = array<i64: 4, 16, 16>}, {pipeline_mode = #tpu.pipeline_mode<synchronous>, transform_indices = @transform_1, window_bounds = array<i64: 16, 32>}, {pipeline_mode = #tpu.pipeline_mode<synchronous>, transform_indices = @transform_2, window_bounds = array<i64: 16, 32>}, {transform_indices = @transform_3, window_bounds = array<i64: 4, 32, 32>}]} {
    %c0 = arith.constant 0 : index
    %c0_0 = arith.constant 0 : index
    %c0_1 = arith.constant 0 : index
    %0 = vector.load %arg1[%c0, %c0_0, %c0_1] : memref<4x16x16xf32, #tpu.memory_space<vmem>>, vector<4x16x16xf32>
    %1 = tpu.transpose %0, [0, 2, 1] : vector<4x16x16xf32> -> vector<4x16x16xf32>
    %c0_2 = arith.constant 0 : index
    %c0_3 = arith.constant 0 : index
    %2 = vector.load %arg2[%c0_2, %c0_3] : memref<16x32xf32, #tpu.memory_space<vmem>>, vector<16x32xf32>
    %cst = arith.constant dense<0.000000e+00> : vector<4x16x32xf32>
    %3 = tpu.matmul %1, %2, %cst {dimension_numbers = #tpu.dot_dimension_numbers<[2], [0], [0, 1], [1], [0, 0, 0, 1, 1, 1], [], []>} : vector<4x16x16xf32>, vector<16x32xf32>, vector<4x16x32xf32> -> vector<4x16x32xf32>
    %4 = tpu.transpose %3, [0, 2, 1] : vector<4x16x32xf32> -> vector<4x32x16xf32>
    %c0_4 = arith.constant 0 : index
    %c0_5 = arith.constant 0 : index
    %5 = vector.load %arg3[%c0_4, %c0_5] : memref<16x32xf32, #tpu.memory_space<vmem>>, vector<16x32xf32>
    %cst_6 = arith.constant dense<0.000000e+00> : vector<4x32x32xf32>
    %6 = tpu.matmul %4, %5, %cst_6 {dimension_numbers = #tpu.dot_dimension_numbers<[2], [0], [0, 1], [1], [0, 0, 0, 1, 1, 1], [], []>} : vector<4x32x16xf32>, vector<16x32xf32>, vector<4x32x32xf32> -> vector<4x32x32xf32>
    %c0_7 = arith.constant 0 : index
    %c0_8 = arith.constant 0 : index
    %c0_9 = arith.constant 0 : index
    %7 = vector.load %arg4[%c0_7, %c0_8, %c0_9] : memref<4x32x32xf32, #tpu.memory_space<vmem>>, vector<4x32x32xf32>
    tpu.vector_store %arg4[%c0_7, %c0_8, %c0_9], %6 {strides = array<i32>} : memref<4x32x32xf32, #tpu.memory_space<vmem>>, vector<4x32x32xf32>,
    return
  }
  func.func @transform_0(%arg0: i32) -> (i32, i32, i32) {
    %c0_i32 = arith.constant 0 : i32
    %c0_i32_0 = arith.constant 0 : i32
    %c0_i32_1 = arith.constant 0 : i32
    return %arg0, %c0_i32, %c0_i32_0 : i32, i32, i32
  }
  func.func @transform_1(%arg0: i32) -> (i32, i32) {
    %c0_i32 = arith.constant 0 : i32
    %c0_i32_0 = arith.constant 0 : i32
    %c0_i32_1 = arith.constant 0 : i32
    return %c0_i32, %c0_i32_0 : i32, i32
  }
  func.func @transform_2(%arg0: i32) -> (i32, i32) {
    %c0_i32 = arith.constant 0 : i32
    %c0_i32_0 = arith.constant 0 : i32
    %c0_i32_1 = arith.constant 0 : i32
    return %c0_i32, %c0_i32_0 : i32, i32
  }
  func.func @transform_3(%arg0: i32) -> (i32, i32, i32) {
    %c0_i32 = arith.constant 0 : i32
    %c0_i32_0 = arith.constant 0 : i32
    %c0_i32_1 = arith.constant 0 : i32
    return %arg0, %c0_i32, %c0_i32_0 : i32, i32, i32
  }
}

</mosaic_0001>

<bundles_post_ra>
// kernel: tpu_custom_call.1
= control target key start
LH: loop header
LB: loop body
LE: loop exit
PB: predicated region body
PF: predicated region fallthrough
CT: control target
= control target key end

     0   :  { %8 = vsyncpa [#allocation3], 0  ;;  %s1022_s0 = inlined_call_operand.hbm [shape: f32[4,16,16], index: 0, kind: input, shape index: {}]   ;;  %s1023_s1 = inlined_call_operand.hbm [shape: f32[16,32], index: 1, kind: input, shape index: {}]   ;;  %s1024_s2 = inlined_call_operand.hbm [shape: f32[16,32], index: 2, kind: input, shape index: {}]   ;;  %s1025_s3 = inlined_call_operand.hbm [shape: f32[4,32,32], index: 3, kind: output, shape index: {}]  }
   0x1   :  { %9 = vsyncpa [#allocation6], 0 }
   0x2   :  { %10 = vsyncpa [#allocation4], 0  ;;  %s889_s12 = smov [#allocation5]   ;;  %s890_s14 = smov [#allocation2]  }
   0x3   :  { %s28_s13 = sshll.u32 %s889_s12, 4  ;;  %s16_s15 = sshll.u32 %s890_s14, 4  ;;  %s29_s13 = int_to_ptr.vmem [resolvable:$true] %s28_s13  ;;  %s915_s15 = int_to_ptr.vmem [resolvable:$true] %s16_s15 }
   0x4   :  { %s795_s18 = scalar_lea.hbm %s1023_s1, 256 }
   0x5   :  { %p796_p0 = scmp.ne.s32.totalorder %s1023_s1, %s795_s18  ;;  %p799_p1 = scmp.lt.u32.totalorder %s795_s18, %s1023_s1 }
   0x7   :  { %p801_p2 = pnand %p799_p1, %p796_p0 }
   0x9   :  { %804 = shalt.err (!%p801_p2)
}
   0xa   :  { %s805_s23 = scalar_lea.vmem %s29_s13, 256  ;;  %p810_p4 = scmp.lt.s32.totalorder %s29_s13, %s29_s13 }
   0xb   :  { %p806_p3 = scmp.ne.s32.totalorder %s29_s13, %s805_s23  ;;  %p811_p5 = scmp.lt.s32.totalorder %s805_s23, %s805_s23 }
   0xd   :  { %p812_p6 = por %p811_p5, %p810_p4 }
   0xf   :  { %p813_p7 = pnand %p812_p6, %p806_p3 }
  0x11   :  { %816 = shalt.err (!%p813_p7)
}
  0x12   :  { %s891_s24 = smov 128   ;;  %s892_s25 = smov 8  }
  0x13   :  { %34 = dma.hbm_to_vmem [thread:$0]  %s1023_s1, 256, %s29_s13, [#allocation6], %s891_s24, %s891_s24, %s892_s25  }
  0x14   :  { %s817_s30 = scalar_lea.hbm %s1022_s0, 1024 }
  0x15   :  { %p818_p8 = scmp.ne.s32.totalorder %s1022_s0, %s817_s30  ;;  %p821_p9 = scmp.lt.u32.totalorder %s817_s30, %s1022_s0 }
  0x17   :  { %p823_p10 = pnand %p821_p9, %p818_p8 }
  0x19   :  { %826 = shalt.err (!%p823_p10)
}
  0x1a   :  { %s827_s8 = scalar_lea.vmem %s915_s15, 1024  ;;  %p832_p12 = scmp.lt.s32.totalorder %s915_s15, %s915_s15 }
  0x1b   :  { %p828_p11 = scmp.ne.s32.totalorder %s915_s15, %s827_s8  ;;  %p833_p13 = scmp.lt.s32.totalorder %s827_s8, %s827_s8 }
  0x1d   :  { %p834_p0 = por %p833_p13, %p832_p12 }
  0x1f   :  { %p835_p1 = pnand %p834_p0, %p828_p11 }
  0x21   :  { %838 = shalt.err (!%p835_p1)
}
  0x22   :  { %22 = dma.hbm_to_vmem [thread:$0]  %s1022_s0, 1024, %s915_s15, [#allocation3], %s891_s24, %s891_s24, %s892_s25  }
  0x23   :  { %s893_s10 = smov [#allocation7]   ;;  %s839_s14 = scalar_lea.hbm %s1024_s2, 256 }
  0x24   :  { %s40_s11 = sshll.u32 %s893_s10, 4  ;;  %p840_p2 = scmp.ne.s32.totalorder %s1024_s2, %s839_s14  ;;  %s41_s11 = int_to_ptr.vmem [resolvable:$true] %s40_s11 }
  0x25   :  { %p843_p3 = scmp.lt.u32.totalorder %s839_s14, %s1024_s2 }
  0x27   :  { %p845_p4 = pnand %p843_p3, %p840_p2 }
  0x29   :  { %848 = shalt.err (!%p845_p4)
}
  0x2a   :  { %s849_s20 = scalar_lea.vmem %s41_s11, 256  ;;  %p854_p6 = scmp.lt.s32.totalorder %s41_s11, %s41_s11 }
  0x2b   :  { %p850_p5 = scmp.ne.s32.totalorder %s41_s11, %s849_s20  ;;  %p855_p7 = scmp.lt.s32.totalorder %s849_s20, %s849_s20 }
  0x2d   :  { %p856_p8 = por %p855_p7, %p854_p6 }
  0x2f   :  { %p857_p9 = pnand %p856_p8, %p850_p5 }
  0x31   :  { %860 = shalt.err (!%p857_p9)
}
  0x32   :  { %46 = dma.hbm_to_vmem [thread:$0]  %s1024_s2, 256, %s41_s11, [#allocation6], %s891_s24, %s891_s24, %s892_s25  }
  0x33   :  { %883 = dma.done.wait [#allocation3], 1024  }
  0x34   :  { %884 = vsyncadd [#allocation3], 4294966272 }
  0x35   :  { %885 = dma.done.wait [#allocation6], 512  }
  0x36   :  { %886 = vsyncadd [#allocation6], 4294966784  ;;  %v56_v0 = vld [vmem:[#allocation2] sm:$0xff]  ;;  %v58_v1 = vld [vmem:[#allocation2 + $0x10] sm:$0xff]  ;;  %vm194_vm0 = vcmask 130048   ;;  %vm647_vm1 = vcmask 261120  }
  0x37   :  { %64 = vxpose.xlu0.b32.start [1/2] (short) (narrow) %v56_v0, 16  ;;  %96 = vxpose.xlu1.b32.start [1/2] (short) (narrow) %v58_v1, 16  ;;  %v57_v2 = vld [vmem:[#allocation2 + $0x8] sm:$0xff]  ;;  %v59_v3 = vld [vmem:[#allocation2 + $0x18] sm:$0xff]  ;;  %v192_v4 = vld [vmem:[#allocation5] sm:$0xff]  ;;  %s894_s2 = smov [#allocation8]  }
  0x38   :  { %v193_v5 = vld [vmem:[#allocation5 + $0x8] sm:$0xff]  ;;  %v60_v7 = vld [vmem:[#allocation2 + $0x20] sm:$0xff]  ;;  %v62_v8 = vld [vmem:[#allocation2 + $0x30] sm:$0xff]  ;;  %s669_s21 = sshll.u32 %s894_s2, 4  ;;  %s670_s21 = int_to_ptr.vmem [resolvable:$true] %s669_s21 }
  0x39   :  { %v778_v6 = vpack.c.bf16 %v193_v5, %v192_v4  ;;  %v61_v9 = vld [vmem:[#allocation2 + $0x28] sm:$0xff]  ;;  %v63_v10 = vld [vmem:[#allocation2 + $0x38] sm:$0xff]  ;;  %v452_v23 = vld [vmem:[#allocation7] sm:$0xff]  ;;  %s861_s22 = scalar_lea.vmem %s670_s21, 2048  ;;  %p866_p11 = scmp.lt.s32.totalorder %s670_s21, %s670_s21 }
  0x3a   :  { %v453_v24 = vld [vmem:[#allocation7 + $0x8] sm:$0xff]  ;;  %p862_p10 = scmp.ne.s32.totalorder %s670_s21, %s861_s22  ;;  %p867_p12 = scmp.lt.s32.totalorder %s861_s22, %s861_s22 }
  0x3b   :  { %65 = vxpose.xlu0.b32.end [2/2] (short) (narrow) %v57_v2, 16  ;;  %97 = vxpose.xlu1.b32.end [2/2] (short) (narrow) %v59_v3, 16  ;;  %v782_v25 = vpack.c.bf16 %v453_v24, %v452_v23 }
  0x3c   :  { %779 = vmatprep.subr.bf16.mxu0 %v778_v6  ;;  %p868_p13 = por %p867_p12, %p866_p11 }
  0x3d   :  { %781 = vmatpush3.bf16.msra.mxu0 %v778_v6  ;;  %786 = vmatprep.subr.bf16.mxu1 %v782_v25 }
  0x3e   :  { %783 = vmatprep.subr.bf16.mxu0 %v782_v25  ;;  %787 = vmatpush3.bf16.msra.mxu1 %v782_v25  ;;  %p869_p0 = pnand %p868_p13, %p862_p10 }
  0x3f   :  { %128 = vxpose.xlu0.b32.start [1/2] (short) (narrow) %v60_v7, 16  ;;  %160 = vxpose.xlu1.b32.start [1/2] (short) (narrow) %v62_v8, 16 }
  0x43   :  { %129 = vxpose.xlu0.b32.end [2/2] (short) (narrow) %v61_v9, 16  ;;  %161 = vxpose.xlu1.b32.end [2/2] (short) (narrow) %v63_v10, 16 }
  0xb7   :  { %v80_v11 = vpop.trf.xlu0  ;;  %v112_v12 = vpop.trf.xlu1 }
  0xb8   :  { %738 = vmatprep.mubr.msk.f32.mxu0 %vm194_vm0, %v80_v11 }
  0xbb   :  { %v81_v13 = vpop.trf.xlu0  ;;  %v113_v14 = vpop.trf.xlu1 }
  0xbc   :  { %739 = vmatmul.mubr.msk.f32.vlgmr.msra.gmra.mrb[0].mxu0 %vm194_vm0, %v81_v13 }
  0xbd   :  { %741 = vmatprep.mubr.msk.f32.mxu0 %vm194_vm0, %v112_v12  ;;  %785 = vmatpush3.bf16.msra.mxu0 %v782_v25 }
  0xbf   :  { %v144_v15 = vpop.trf.xlu0  ;;  %v176_v16 = vpop.trf.xlu1 }
  0xc0   :  { %742 = vmatmul.mubr.msk.f32.gmra.mrb[2].mxu0 %vm194_vm0, %v113_v14 }
  0xc1   :  { %744 = vmatprep.mubr.msk.f32.mxu0 %vm194_vm0, %v144_v15 }
  0xc3   :  { %v145_v17 = vpop.trf.xlu0  ;;  %v177_v18 = vpop.trf.xlu1 }
  0xc4   :  { %745 = vmatmul.mubr.msk.f32.gmra.mrb[4].mxu0 %vm194_vm0, %v145_v17 }
  0xc5   :  { %747 = vmatprep.mubr.msk.f32.mxu0 %vm194_vm0, %v176_v16 }
  0xc8   :  { %748 = vmatmul.mubr.msk.f32.gmra.mrb[6].mxu0 %vm194_vm0, %v177_v18 }
 0x18f   :  { %v740_v19 = vpop.f32.mrb[0].mxu0 }
 0x190   :  { %v285_v20 = vpop.f32.mrb[1].mxu0 }
 0x193   :  { %v743_v21 = vpop.f32.mrb[2].mxu0 }
 0x194   :  { %v295_v22 = vpop.f32.mrb[3].mxu0 }
 0x195   :  { %356 = vxpose.xlu0.b32.start [1/2] (short) (narrow) %v295_v22, 32 }
 0x197   :  { %v746_v26 = vpop.f32.mrb[4].mxu0 }
 0x198   :  { %v305_v27 = vpop.f32.mrb[5].mxu0 }
 0x199   :  { %357 = vxpose.xlu0.b32.end [2/2] (short) (narrow) %v743_v21, 32  ;;  %388 = vxpose.xlu1.b32.start [1/2] (short) (narrow) %v305_v27, 32 }
 0x19b   :  { %v749_v28 = vpop.f32.mrb[6].mxu0 }
 0x19c   :  { %v315_v29 = vpop.f32.mrb[7].mxu0 }
 0x19d   :  { %389 = vxpose.xlu1.b32.end [2/2] (short) (narrow) %v746_v26, 32 }
 0x1a2   :  { %324 = vxpose.xlu0.b32.start [1/2] (short) (narrow) %v285_v20, 32 }
 0x1a6   :  { %325 = vxpose.xlu0.b32.end [2/2] (short) (narrow) %v740_v19, 32  ;;  %420 = vxpose.xlu1.b32.start [1/2] (short) (narrow) %v315_v29, 32 }
 0x1aa   :  { %421 = vxpose.xlu1.b32.end [2/2] (short) (narrow) %v749_v28, 32 }
 0x215   :  { %v372_v30 = vpop.trf.xlu0 }
 0x216   :  { %760 = vmatprep.mubr.msk.f32.mxu1 %vm194_vm0, %v372_v30 }
 0x219   :  { %v404_v31 = vpop.trf.xlu1  ;;  %v373_v32 = vpop.trf.xlu0 }
 0x21a   :  { %761 = vmatmul.mubr.msk.f32.vlgmr.msra.gmra.mrb[0].mxu1 %vm194_vm0, %v373_v32 }
 0x21d   :  { %v405_v33 = vpop.trf.xlu1  ;;  %v374_v34 = vpop.trf.xlu0 }
 0x21e   :  { %763 = vmatprep.mubr.msk.f32.mxu1 %vm194_vm0, %v374_v34 }
 0x221   :  { %v406_v35 = vpop.trf.xlu1  ;;  %v375_v36 = vpop.trf.xlu0 }
 0x222   :  { %764 = vmatmul.mubr.msk.f32.gmra.mrb[2].mxu1 %vm194_vm0, %v375_v36 }
 0x223   :  { %766 = vmatprep.mubr.msk.f32.mxu1 %vm194_vm0, %v404_v31 }
 0x225   :  { %v407_v37 = vpop.trf.xlu1  ;;  %v340_v38 = vpop.trf.xlu0 }
 0x226   :  { %767 = vmatmul.mubr.msk.f32.gmra.mrb[4].mxu1 %vm194_vm0, %v405_v33  ;;  %754 = vmatprep.mubr.msk.f32.mxu0 %vm194_vm0, %v340_v38 }
 0x227   :  { %769 = vmatprep.mubr.msk.f32.mxu1 %vm194_vm0, %v406_v35 }
 0x229   :  { %v436_v39 = vpop.trf.xlu1  ;;  %v341_v40 = vpop.trf.xlu0 }
 0x22a   :  { %770 = vmatmul.mubr.msk.f32.gmra.mrb[6].mxu1 %vm194_vm0, %v407_v37  ;;  %755 = vmatmul.mubr.msk.f32.vlgmr.msra.gmra.mrb[8].mxu0 %vm194_vm0, %v341_v40 }
 0x22b   :  { %772 = vmatprep.mubr.msk.f32.mxu1 %vm194_vm0, %v436_v39 }
 0x22d   :  { %v437_v41 = vpop.trf.xlu1  ;;  %v342_v42 = vpop.trf.xlu0 }
 0x22e   :  { %773 = vmatmul.mubr.msk.f32.gmra.mrb[8].mxu1 %vm194_vm0, %v437_v41  ;;  %757 = vmatprep.mubr.msk.f32.mxu0 %vm194_vm0, %v342_v42 }
 0x231   :  { %v438_v43 = vpop.trf.xlu1  ;;  %v343_v44 = vpop.trf.xlu0 }
 0x232   :  { %775 = vmatprep.mubr.msk.f32.mxu1 %vm194_vm0, %v438_v43  ;;  %758 = vmatmul.mubr.msk.f32.gmra.mrb[10].mxu0 %vm194_vm0, %v343_v44 }
 0x235   :  { %v439_v45 = vpop.trf.xlu1 }
 0x236   :  { %776 = vmatmul.mubr.msk.f32.gmra.mrb[10].mxu1 %vm194_vm0, %v439_v45 }
 0x2ed   :  { %v762_v46 = vpop.f32.mrb[0].mxu1 }
 0x2ee   :  { %653 = vst.msk [vmem:[#allocation8 + $0x28] sm:$0xff] %vm647_vm1, %v762_v46  ;;  %v588_v47 = vpop.f32.mrb[1].mxu1 }
 0x2ef   :  { %652 = vst.msk [vmem:[#allocation8 + $0x20] sm:$0xff] %vm647_vm1, %v588_v47 }
 0x2f5   :  { %v765_v48 = vpop.f32.mrb[2].mxu1 }
 0x2f6   :  { %655 = vst.msk [vmem:[#allocation8 + $0x38] sm:$0xff] %vm647_vm1, %v765_v48  ;;  %v598_v49 = vpop.f32.mrb[3].mxu1 }
 0x2f7   :  { %654 = vst.msk [vmem:[#allocation8 + $0x30] sm:$0xff] %vm647_vm1, %v598_v49 }
 0x2f9   :  { %v768_v50 = vpop.f32.mrb[4].mxu1 }
 0x2fa   :  { %657 = vst.msk [vmem:[#allocation8 + $0x48] sm:$0xff] %vm647_vm1, %v768_v50  ;;  %v608_v51 = vpop.f32.mrb[5].mxu1 }
 0x2fb   :  { %656 = vst.msk [vmem:[#allocation8 + $0x40] sm:$0xff] %vm647_vm1, %v608_v51 }
 0x2fd   :  { %v771_v52 = vpop.f32.mrb[6].mxu1  ;;  %v756_v53 = vpop.f32.mrb[8].mxu0 }
 0x2fe   :  { %659 = vst.msk [vmem:[#allocation8 + $0x58] sm:$0xff] %vm647_vm1, %v771_v52  ;;  %v618_v54 = vpop.f32.mrb[7].mxu1  ;;  %649 = vst.msk [vmem:[#allocation8 + $0x8] sm:$0xff] %vm647_vm1, %v756_v53  ;;  %v568_v55 = vpop.f32.mrb[9].mxu0 }
 0x2ff   :  { %658 = vst.msk [vmem:[#allocation8 + $0x50] sm:$0xff] %vm647_vm1, %v618_v54  ;;  %648 = vst.msk [vmem:[#allocation8] sm:$0xff] %vm647_vm1, %v568_v55 }
 0x301   :  { %v774_v56 = vpop.f32.mrb[8].mxu1 }
 0x302   :  { %661 = vst.msk [vmem:[#allocation8 + $0x68] sm:$0xff] %vm647_vm1, %v774_v56  ;;  %v628_v57 = vpop.f32.mrb[9].mxu1 }
 0x303   :  { %660 = vst.msk [vmem:[#allocation8 + $0x60] sm:$0xff] %vm647_vm1, %v628_v57 }
 0x305   :  { %v759_v58 = vpop.f32.mrb[10].mxu0 }
 0x306   :  { %651 = vst.msk [vmem:[#allocation8 + $0x18] sm:$0xff] %vm647_vm1, %v759_v58  ;;  %v578_v59 = vpop.f32.mrb[11].mxu0 }
 0x307   :  { %650 = vst.msk [vmem:[#allocation8 + $0x10] sm:$0xff] %vm647_vm1, %v578_v59 }
 0x309   :  { %v777_v60 = vpop.f32.mrb[10].mxu1 }
 0x30a   :  { %663 = vst.msk [vmem:[#allocation8 + $0x78] sm:$0xff] %vm647_vm1, %v777_v60  ;;  %v638_v61 = vpop.f32.mrb[11].mxu1 }
 0x30b   :  { %662 = vst.msk [vmem:[#allocation8 + $0x70] sm:$0xff] %vm647_vm1, %v638_v61 }
 0x30c   :  { %872 = shalt.err (!%p869_p0)
}
 0x30d   :  { %s873_s27 = scalar_lea.hbm %s1025_s3, 2048 }
 0x30e   :  { %p874_p1 = scmp.ne.s32.totalorder %s1025_s3, %s873_s27  ;;  %p877_p2 = scmp.lt.u32.totalorder %s873_s27, %s1025_s3 }
 0x310   :  { %p879_p3 = pnand %p877_p2, %p874_p1 }
 0x312   :  { %882 = shalt.err (!%p879_p3)
}
 0x313   :  { %675 = dma.vmem_to_hbm [thread:$0]  %s670_s21, 2048, %s1025_s3, [#allocation4], %s891_s24, %s891_s24, %s892_s25  }
 0x314   :  { %887 = dma.done.wait [#allocation4], 2048  }
 0x315   :  { %888 = vsyncadd [#allocation4], 4294965248 }
 0x316   :  { %679 = vsyncpa [#allocation3], 1 }
 0x317   :  { %680 = vsyncpa [#allocation6], 1 }
 0x318   :  { %681 = vsyncpa [#allocation4], 1 }

</bundles_post_ra>
